<compile_context>
chip_gen: v7x
topology: tpu7x:2x2x1
jax: 0.10.0
libtpu: 0.0.40
codegen_flags: <defaults>
</compile_context>

<pallas_src>
import functools

import jax
import jax.numpy as jnp
from jax.experimental import pallas as pl
from jax.experimental.pallas import tpu as pltpu


# ---------------------------------------------------------------------------
# Fused projection kernel: g = x @ [wl | wr] + [bl | br]
# ---------------------------------------------------------------------------
def _proj_kernel(x_ref, w_ref, b_ref, out_ref):
    out_ref[...] = (
        jnp.dot(x_ref[...], w_ref[...], preferred_element_type=jnp.float32)
        + b_ref[...]
    )


def _fused_projection(x, w_cat, b_cat, *, row_tile):
    n, f_in = x.shape
    wout = w_cat.shape[1]
    return pl.pallas_call(
        _proj_kernel,
        out_shape=jax.ShapeDtypeStruct((n, wout), jnp.float32),
        grid=(n // row_tile,),
        in_specs=[
            pl.BlockSpec((row_tile, f_in), lambda i: (i, 0)),
            pl.BlockSpec((f_in, wout), lambda i: (0, 0)),
            pl.BlockSpec((1, wout), lambda i: (0, 0)),
        ],
        out_specs=pl.BlockSpec((row_tile, wout), lambda i: (i, 0)),
        compiler_params=pltpu.CompilerParams(
            dimension_semantics=("parallel",)),
    )(x, w_cat, b_cat)


# ---------------------------------------------------------------------------
# Attention + aggregation kernel (one row tile of target nodes per grid step)
# ---------------------------------------------------------------------------
def _gatv2_attention_kernel(att_ref, adj_ref, glT_ref, gl_agg_ref, gr_ref,
                            bias_ref, out_ref, acc_ref, *,
                            heads, out_ch, out_width, valid_cols, activation):
    neg_inf = jnp.float32(-1e30)

    # Additive adjacency mask, computed ONCE per row tile (not per head).
    mask_bias = jnp.where(adj_ref[...] > 0, 0.0, neg_inf)       # [TI, N] f32

    glT = glT_ref[...]                                           # [HC, N]  f32
    gr = gr_ref[...]                                             # [TI, HC] f32
    gl_agg = gl_agg_ref[...]                                     # [N, OW]  bf16

    col_ids = jax.lax.broadcasted_iota(jnp.int32, (1, out_width), 1)

    acc_ref[...] = jnp.zeros_like(acc_ref)

    for h in range(heads):
        # Lane-dense attention scores: source dim j stays on lanes.
        e = mask_bias
        for c in range(out_ch):
            col = h * out_ch + c
            s = gr[:, col:col + 1] + glT[col:col + 1, :]         # [TI, N]
            s = jnp.maximum(s, 0.2 * s)                          # leaky_relu(0.2)
            e = e + att_ref[col] * s                             # scalar from SMEM

        # Masked softmax over incoming edges (source j on lanes).
        m = jnp.max(e, axis=1, keepdims=True)
        p = jnp.exp(e - m)
        denom = jnp.sum(p, axis=1, keepdims=True)
        alpha = p * pl.reciprocal(denom, approx=True)            # [TI, N]

        # Lane-dense aggregation: zero the other heads' columns of gl and do a
        # full-output-width matmul, accumulating into the VMEM scratch.
        if heads > 1:
            head_mask = jnp.logical_and(col_ids >= h * out_ch,
                                        col_ids < (h + 1) * out_ch)
            gl_h = jnp.where(head_mask, gl_agg, jnp.zeros((), gl_agg.dtype))
        else:
            gl_h = gl_agg                                        # padded cols are 0
        acc_ref[...] += jnp.dot(alpha.astype(gl_agg.dtype), gl_h,
                                preferred_element_type=jnp.float32)

    y = acc_ref[...] + bias_ref[...]

    if activation == "elu":
        y = jnp.where(y > 0, y, jnp.exp(jnp.minimum(y, 0.0)) - 1.0)
    elif activation == "log_softmax":
        valid = col_ids < valid_cols                             # [1, OW]
        y_m = jnp.where(valid, y, neg_inf)
        mx = jnp.max(y_m, axis=1, keepdims=True)
        z = y - mx
        ez = jnp.where(valid, jnp.exp(z), 0.0)
        lse = jnp.log(jnp.sum(ez, axis=1, keepdims=True))
        y = z - lse

    out_ref[...] = y


# ---------------------------------------------------------------------------
# Layer wrapper
# ---------------------------------------------------------------------------
def gatv2_layer(x, adj_i8, wl, bl, wr, br, att, bias, *, heads, out_ch,
                activation, out_width=None, row_tile=128):
    n = x.shape[0]
    hc = heads * out_ch
    if out_width is None:
        out_width = hc
    if n % row_tile != 0:
        row_tile = n  # fall back to a single row tile for odd sizes

    # Fused input projections (one MXU pass): [x@wl | x@wr] + [bl | br].
    w_cat = jnp.concatenate([wl, wr], axis=1)
    b_cat = jnp.concatenate([bl, br], axis=1)
    g = _fused_projection(x, w_cat, b_cat, row_tile=row_tile)
    gl = g[:, :hc]                    # source-side features (lin_l) -> aggregated
    gr = g[:, hc:]                    # target-side features (lin_r)

    # Wrapper-side layout plumbing (one-time XLA ops):
    glT = jnp.transpose(gl)                            # [HC, N]  lane-dense source dim
    pad = out_width - hc
    gl_agg = gl if pad == 0 else jnp.pad(gl, ((0, 0), (0, pad)))
    gl_agg = gl_agg.astype(jnp.bfloat16)               # bf16 aggregation operand
    bias_p = bias if pad == 0 else jnp.pad(bias, ((0, 0), (0, pad)))
    att_flat = att.reshape(-1).astype(jnp.float32)     # [HC] scalars -> SMEM

    kernel = functools.partial(
        _gatv2_attention_kernel, heads=heads, out_ch=out_ch,
        out_width=out_width, valid_cols=hc, activation=activation)

    # Rough VMEM budget (double-buffered tiles + resident arrays + score
    # intermediates), with headroom, capped for v7x's 64 MiB physical VMEM.
    vmem_bytes = int(
        2 * (row_tile * n)                # adj int8 tile
        + 2 * (row_tile * hc * 4)         # gr tile
        + 2 * (row_tile * out_width * 4)  # output tile
        + hc * n * 4                      # glT (resident)
        + n * out_width * 2               # gl_agg bf16 (resident)
        + out_width * 4                   # bias
        + row_tile * out_width * 4        # acc scratch
        + 6 * row_tile * n * 4)           # e / p / alpha / mask intermediates
    vmem_limit = min(max(int(vmem_bytes * 1.5), 16 * 1024 * 1024),
                     56 * 1024 * 1024)

    return pl.pallas_call(
        kernel,
        out_shape=jax.ShapeDtypeStruct((n, out_width), jnp.float32),
        grid=(n // row_tile,),
        in_specs=[
            pl.BlockSpec(memory_space=pltpu.MemorySpace.SMEM),    # att scalars
            pl.BlockSpec((row_tile, n), lambda i: (i, 0)),        # adj int8 row tile
            pl.BlockSpec((hc, n), lambda i: (0, 0)),              # glT (resident)
            pl.BlockSpec((n, out_width), lambda i: (0, 0)),       # gl_agg (resident)
            pl.BlockSpec((row_tile, hc), lambda i: (i, 0)),       # gr row tile
            pl.BlockSpec((1, out_width), lambda i: (0, 0)),       # bias
        ],
        out_specs=pl.BlockSpec((row_tile, out_width), lambda i: (i, 0)),
        scratch_shapes=[pltpu.VMEM((row_tile, out_width), jnp.float32)],
        compiler_params=pltpu.CompilerParams(
            dimension_semantics=("parallel",),
            vmem_limit_bytes=vmem_limit),
    )(att_flat, adj_i8, glT, gl_agg, gr, bias_p)


# ---------------------------------------------------------------------------
# Full model forward
# ---------------------------------------------------------------------------
def edge_index_to_adj_i8(edge_index, n):
    # adj[i, j] = 1 iff edge j -> i; GATv2Conv removes then re-adds self loops.
    src, dst = edge_index[0], edge_index[1]
    adj = jnp.zeros((n, n), jnp.int8).at[dst, src].set(1)
    diag = jnp.arange(n)
    return adj.at[diag, diag].set(1)


def glorot(key, shape):
    fan_in, fan_out = shape[0], shape[-1]
    limit = (6.0 / (fan_in + fan_out)) ** 0.5
    return jax.random.uniform(key, shape, jnp.float32, -limit, limit)


def gat_forward(x, edge_index, params):
    # TODO(synk): F.dropout(p=0.6) and GATv2's attention dropout are training-only;
    # this implements eval-mode semantics (dropout == identity).
    n = x.shape[0]
    adj = edge_index_to_adj_i8(edge_index, n)
    h1 = gatv2_layer(x, adj,
                     params["wl1"], params["bl1"], params["wr1"], params["br1"],
                     params["att1"], params["bias1"],
                     heads=8, out_ch=8, activation="elu")
    nc = params["num_classes"]
    # Layer 2: lane-padded (7 -> 128) output inside the kernel, sliced here.
    out_p = gatv2_layer(h1, adj,
                        params["wl2"], params["bl2"], params["wr2"], params["br2"],
                        params["att2"], params["bias2"],
                        heads=1, out_ch=nc, activation="log_softmax",
                        out_width=128)
    return out_p[:, :nc]


if __name__ == "__main__":
    # Small synthetic "Cora-like" graph (exercises the row-tile grid: 2 tiles).
    N = 256           # nodes
    F_IN = 64         # input features (stand-in for cora num_features)
    NUM_CLASSES = 7   # cora num_classes
    H1, C1 = 8, 8     # layer1: heads=8, out_channels=8 -> 64
    E = 512           # edges

    key = jax.random.PRNGKey(0)
    ks = jax.random.split(key, 16)

    x = jax.random.normal(ks[0], (N, F_IN), jnp.float32)
    src = jax.random.randint(ks[1], (E,), 0, N)
    dst = jax.random.randint(ks[2], (E,), 0, N)
    edge_index = jnp.stack([src, dst], axis=0)   # [2, E]

    params = {
        "num_classes": NUM_CLASSES,
        # layer 1: GATv2Conv(F_IN, 8, heads=8)
        "wl1": glorot(ks[3], (F_IN, H1 * C1)),
        "bl1": jnp.zeros((1, H1 * C1), jnp.float32),
        "wr1": glorot(ks[4], (F_IN, H1 * C1)),
        "br1": jnp.zeros((1, H1 * C1), jnp.float32),
        "att1": glorot(ks[5], (H1, C1)),
        "bias1": jnp.zeros((1, H1 * C1), jnp.float32),
        # layer 2: GATv2Conv(64, NUM_CLASSES, heads=1, concat=True)
        "wl2": glorot(ks[6], (H1 * C1, NUM_CLASSES)),
        "bl2": jnp.zeros((1, NUM_CLASSES), jnp.float32),
        "wr2": glorot(ks[7], (H1 * C1, NUM_CLASSES)),
        "br2": jnp.zeros((1, NUM_CLASSES), jnp.float32),
        "att2": glorot(ks[8], (1, NUM_CLASSES)),
        "bias2": jnp.zeros((1, NUM_CLASSES), jnp.float32),
    }

    out = gat_forward(x, edge_index, params)
    out = jax.block_until_ready(out)
    assert out.shape == (N, NUM_CLASSES)
    assert bool(jnp.all(jnp.isfinite(out)))
    # rows of log_softmax must (approximately) exp-sum to 1
    assert bool(jnp.allclose(jnp.sum(jnp.exp(out), axis=1), 1.0, atol=1e-4))
    print("KERNEL_OK")
</pallas_src>

<mosaic_0001>
module attributes {stable_mosaic.version = 11 : i64} {
  func.func @_proj_kernel(%arg0: i32, %arg1: memref<128x64xf32, #tpu.memory_space<vmem>>, %arg2: memref<64x128xf32, #tpu.memory_space<vmem>>, %arg3: memref<1x128xf32, #tpu.memory_space<vmem>>, %arg4: memref<128x128xf32, #tpu.memory_space<vmem>>) attributes {dimension_semantics = [#tpu.dimension_semantics<parallel>], iteration_bounds = array<i64: 2>, scalar_prefetch = 0 : i64, scratch_operands = 0 : i64, tpu.core_type = #tpu.core_type<tc>, window_params = [{transform_indices = @transform_0, window_bounds = array<i64: 128, 64>}, {pipeline_mode = #tpu.pipeline_mode<synchronous>, transform_indices = @transform_1, window_bounds = array<i64: 64, 128>}, {pipeline_mode = #tpu.pipeline_mode<synchronous>, transform_indices = @transform_2, window_bounds = array<i64: 1, 128>}, {transform_indices = @transform_3, window_bounds = array<i64: 128, 128>}]} {
    %c0 = arith.constant 0 : index
    %c0_0 = arith.constant 0 : index
    %0 = vector.load %arg1[%c0, %c0_0] : memref<128x64xf32, #tpu.memory_space<vmem>>, vector<128x64xf32>
    %c0_1 = arith.constant 0 : index
    %c0_2 = arith.constant 0 : index
    %1 = vector.load %arg2[%c0_1, %c0_2] : memref<64x128xf32, #tpu.memory_space<vmem>>, vector<64x128xf32>
    %cst = arith.constant dense<0.000000e+00> : vector<128x128xf32>
    %2 = tpu.matmul %0, %1, %cst {dimension_numbers = #tpu.dot_dimension_numbers<[1], [0], [0], [1], [0, 0, 1, 1], [], []>} : vector<128x64xf32>, vector<64x128xf32>, vector<128x128xf32> -> vector<128x128xf32>
    %c0_3 = arith.constant 0 : index
    %c0_4 = arith.constant 0 : index
    %3 = vector.load %arg3[%c0_3, %c0_4] : memref<1x128xf32, #tpu.memory_space<vmem>>, vector<1x128xf32>
    %4 = vector.broadcast %3 : vector<1x128xf32> to vector<128x128xf32>
    %5 = arith.addf %2, %4 : vector<128x128xf32>
    %c0_5 = arith.constant 0 : index
    %c0_6 = arith.constant 0 : index
    %6 = vector.load %arg4[%c0_5, %c0_6] : memref<128x128xf32, #tpu.memory_space<vmem>>, vector<128x128xf32>
    tpu.vector_store %arg4[%c0_5, %c0_6], %5 {strides = array<i32>} : memref<128x128xf32, #tpu.memory_space<vmem>>, vector<128x128xf32>,
    return
  }
  func.func @transform_0(%arg0: i32) -> (i32, i32) {
    %c0_i32 = arith.constant 0 : i32
    %c0_i32_0 = arith.constant 0 : i32
    return %arg0, %c0_i32 : i32, i32
  }
  func.func @transform_1(%arg0: i32) -> (i32, i32) {
    %c0_i32 = arith.constant 0 : i32
    %c0_i32_0 = arith.constant 0 : i32
    %c0_i32_1 = arith.constant 0 : i32
    return %c0_i32, %c0_i32_0 : i32, i32
  }
  func.func @transform_2(%arg0: i32) -> (i32, i32) {
    %c0_i32 = arith.constant 0 : i32
    %c0_i32_0 = arith.constant 0 : i32
    %c0_i32_1 = arith.constant 0 : i32
    return %c0_i32, %c0_i32_0 : i32, i32
  }
  func.func @transform_3(%arg0: i32) -> (i32, i32) {
    %c0_i32 = arith.constant 0 : i32
    %c0_i32_0 = arith.constant 0 : i32
    return %arg0, %c0_i32 : i32, i32
  }
}

</mosaic_0001>

<bundles_post_ra>
// kernel: tpu_custom_call.1
= control target key start
LH: loop header
LB: loop body
LE: loop exit
PB: predicated region body
PF: predicated region fallthrough
CT: control target
= control target key end

     0   :  { %8 = vsyncpa [#allocation3], 0  ;;  %s921_s0 = inlined_call_operand.vmem [shape: f32[256,64], index: 0, kind: input, shape index: {}]   ;;  %s922_s1 = inlined_call_operand.vmem [shape: f32[64,128], index: 1, kind: input, shape index: {}]   ;;  %s923_s2 = inlined_call_operand.vmem [shape: f32[1,128], index: 2, kind: input, shape index: {}]   ;;  %s924_s3 = inlined_call_operand.hbm [shape: f32[256,128], index: 3, kind: output, shape index: {}]  }
   0x1   :  { %10 = vsyncpa [#allocation3 + $0x1], 0  ;;  %s735_s12 = smov 0   ;;  %s737_s13 = smov 0  }
   0x2   :  { %s739_s14 = smov 0   ;;  %s741_s15 = smov 0  }
   0x3 LB: > { %s756_s16 = sadd.s32 4294967295, %s710_s15   ;;  %s489_s17 = sadd.s32 4294967294, %s710_s15   ;;  %s710_s15 = sphi %s741_s15, %s930_s15   ;;  %s706_s14 = sphi %s739_s14, %s929_s14   ;;  %s702_s13 = sphi %s737_s13, %s928_s13   ;;  %s698_s12 = sphi %s735_s12, %s927_s12  }
   0x4   : > { %s760_s18 = sadd.s32 1, %s710_s15   ;;  %s91_s19 = sadd.s32 1, %s706_s14 }
   0x5   : > { %s88_s20 = ssub.s32 %s710_s15, %s760_s18  ;;  %p101_p0 = scmp.ne.s32.totalorder %s706_s14, %s702_s13 }
   0x6   : > { %p89_p1 = scmp.eq.s32.totalorder %s88_s20, 0  ;;  %p102_p2 = scmp.eq.s32.totalorder %s756_s16, 1 }
   0x7   : > { %p107_p3 = scmp.ne.s32.totalorder %s702_s13, %s698_s12  ;;  %p108_p4 = scmp.eq.s32.totalorder %s489_s17, 1 }
   0x8   : > { %s771_s21 = scalar_select %p89_p1, %s706_s14, %s91_s19  }
   0x9   : > { %p773_p5 = por %p102_p2, %p101_p0  ;;  %p777_p6 = por %p108_p4, %p107_p3 }
   0xa   : > { %p492_p7 = scmp.ge.s32.totalorder %s710_s15, 1  ;;  %p141_p8 = scmp.lt.s32.totalorder %s710_s15, 3 }
   0xc   : > { %p142_p9 = pnand %p492_p7, %p141_p8 }
   0xd   : > { %v188_v0 = vld [vmem:[%s922_s1] sm:$0xff] (!%p142_p9)  ;;  %v189_v1 = vld [vmem:[%s922_s1 + $0x8] sm:$0xff] (!%p142_p9)  ;;  %v190_v2 = vld [vmem:[%s922_s1 + $0x10] sm:$0xff] (!%p142_p9)  ;;  %s494_s30 = sshll.u32 (!%p142_p9), %s756_s16, 4  ;;  %vm203_vm0 = vcmask (!%p142_p9), 523264   ;;  %s162_s27 = sand.u32 (!%p142_p9), 1, %s702_s13  }
   0xe   : > { %145 = sbr.rel (%p142_p9) target bundleno = 275 (0x113), region = 32  ;;  %v583_v3 = vpack.c.bf16 (!%p142_p9), %v189_v1, %v188_v0  ;;  %v191_v4 = vld [vmem:[%s922_s1 + $0x18] sm:$0xff] (!%p142_p9)  ;;  %p166_p10 = scmp.lt.s32.totalorder (!%p142_p9), %s494_s30, 31  ;;  %v192_v6 = vld [vmem:[%s922_s1 + $0x20] sm:$0xff] (!%p142_p9)  ;;  %v193_v7 = vld [vmem:[%s922_s1 + $0x28] sm:$0xff] (!%p142_p9) }
   0xf   : > { %v587_v5 = vpack.c.bf16 (!%p142_p9), %v191_v4, %v190_v2  ;;  %v591_v8 = vpack.c.bf16 (!%p142_p9), %v193_v7, %v192_v6  ;;  %v194_v9 = vld [vmem:[%s922_s1 + $0x30] sm:$0xff] (!%p142_p9)  ;;  %v195_v10 = vld [vmem:[%s922_s1 + $0x38] sm:$0xff] (!%p142_p9)  ;;  %s493_s28 = sshll.u32 (!%p142_p9), %s162_s27, 7  ;;  %v496_v28 = vld [vmem:[%s923_s2] ss:$0 sm:$0xff] (!%p142_p9)  ;;  %s518_s5 = sshll.u32 (!%p142_p9), %s756_s16, 11 }
  0x10   : > { %584 = vmatprep.subr.bf16.mxu0 (!%p142_p9), %v583_v3  ;;  %599 = vmatprep.subr.bf16.mxu1 (!%p142_p9), %v583_v3  ;;  %v595_v13 = vpack.c.bf16 (!%p142_p9), %v195_v10, %v194_v9  ;;  %s851_s4 = scalar_lea.vmem (!%p142_p9), [#allocation2], %s493_s28  ;;  %s870_s16 = scalar_lea.hbm (!%p142_p9), %s924_s3, %s518_s5 }
  0x11   : > { %586 = vmatpush3.bf16.msra.mxu0 (!%p142_p9), %v583_v3  ;;  %603 = vmatpush3.bf16.msra.mxu1 (!%p142_p9), %v583_v3  ;;  %s427_s6 = sshll.u32 (!%p142_p9), %s851_s4, 4  ;;  %s880_s9 = scalar_lea.sflag (!%p142_p9), [#allocation3], %s162_s27  ;;  %s872_s6 = int_to_ptr.vmem [resolvable:$true] %s427_s6 }
  0x12   : > { %588 = vmatprep.subr.bf16.mxu0 (!%p142_p9), %v587_v5  ;;  %600 = vmatprep.subr.bf16.mxu1 (!%p142_p9), %v587_v5  ;;  %s712_s11 = smov (!%p142_p9), [#allocation2]  }
  0x13   : > { %s652_s17 = sshll.u32 (!%p142_p9), %s712_s11, 4  ;;  %s653_s17 = int_to_ptr.vmem [resolvable:$false] %s652_s17 }
  0x14   : > { %s654_s19 = scalar_lea.vmem (!%p142_p9), %s653_s17, 4096  ;;  %p655_p0 = scmp.lt.s32.totalorder (!%p142_p9), %s872_s6, %s653_s17 }
  0x15   : > { %s932_s30 = smov (!%p166_p10, %s494_s30), 31  ;;  %590 = vmatpush3.bf16.msra.mxu0 %v587_v5  ;;  %604 = vmatpush3.bf16.msra.mxu1 %v587_v5 }
  0x16   : > { %s495_s10 = sshll.u32 %s932_s30, 3  ;;  %592 = vmatprep.subr.bf16.mxu0 %v591_v8  ;;  %601 = vmatprep.subr.bf16.mxu1 %v591_v8 }
  0x17   : > { %s811_s26 = scalar_lea.vmem %s921_s0, %s495_s10  ;;  %s648_s10 = scalar_lea.vmem %s872_s6, 2048 }
  0x18   : > { %v172_v11 = vld [vmem:[%s811_s26] sm:$0xff]  ;;  %v173_v14 = vld [vmem:[%s811_s26 + $0x8] sm:$0xff]  ;;  %v174_v16 = vld [vmem:[%s811_s26 + $0x10] sm:$0xff]  ;;  %p649_p11 = scmp.ne.s32.totalorder %s872_s6, %s648_s10  ;;  %p656_p1 = scmp.lt.s32.totalorder %s654_s19, %s648_s10 }
  0x19   : > { %v180_v12 = vld [vmem:[%s811_s26 + $0x40] sm:$0xff]  ;;  %559 = vmatprep.mubr.msk.f32.mxu0 %vm203_vm0, %v172_v11  ;;  %594 = vmatpush3.bf16.msra.mxu0 %v591_v8  ;;  %v181_v15 = vld [vmem:[%s811_s26 + $0x48] sm:$0xff]  ;;  %v182_v17 = vld [vmem:[%s811_s26 + $0x50] sm:$0xff] }
  0x1a   : > { %571 = vmatprep.mubr.msk.f32.mxu1 %vm203_vm0, %v180_v12  ;;  %605 = vmatpush3.bf16.msra.mxu1 %v591_v8  ;;  %v175_v18 = vld [vmem:[%s811_s26 + $0x18] sm:$0xff]  ;;  %v176_v20 = vld [vmem:[%s811_s26 + $0x20] sm:$0xff]  ;;  %v177_v22 = vld [vmem:[%s811_s26 + $0x28] sm:$0xff]  ;;  %p650_p12 = pnand %p649_p11, %p773_p5  ;;  %p657_p2 = por %p656_p1, %p655_p0 }
  0x1b   : > { %596 = vmatprep.subr.bf16.mxu0 %v595_v13  ;;  %602 = vmatprep.subr.bf16.mxu1 %v595_v13  ;;  %v183_v19 = vld [vmem:[%s811_s26 + $0x58] sm:$0xff]  ;;  %v184_v21 = vld [vmem:[%s811_s26 + $0x60] sm:$0xff]  ;;  %v185_v23 = vld [vmem:[%s811_s26 + $0x68] sm:$0xff] }
  0x1c   : > { %v178_v24 = vld [vmem:[%s811_s26 + $0x30] sm:$0xff]  ;;  %v179_v26 = vld [vmem:[%s811_s26 + $0x38] sm:$0xff]  ;;  %p651_p13 = pneg %p650_p12 }
  0x1d   : > { %598 = vmatpush3.bf16.msra.mxu0 %v595_v13  ;;  %v186_v25 = vld [vmem:[%s811_s26 + $0x70] sm:$0xff]  ;;  %v187_v27 = vld [vmem:[%s811_s26 + $0x78] sm:$0xff] }
  0x1e   : > { %606 = vmatpush3.bf16.msra.mxu1 %v595_v13  ;;  %p658_p3 = pnand %p657_p2, %p651_p13 }
  0x20   : > { %560 = vmatmul.mubr.msk.f32.vlgmr.msra.gmra.mrb[0].mxu0 %vm203_vm0, %v173_v14 }
  0x21   : > { %572 = vmatmul.mubr.msk.f32.vlgmr.msra.gmra.mrb[0].mxu1 %vm203_vm0, %v181_v15  ;;  %562 = vmatprep.mubr.msk.f32.mxu0 %vm203_vm0, %v174_v16 }
  0x22   : > { %574 = vmatprep.mubr.msk.f32.mxu1 %vm203_vm0, %v182_v17 }
  0x24   : > { %563 = vmatmul.mubr.msk.f32.gmra.mrb[2].mxu0 %vm203_vm0, %v175_v18 }
  0x25   : > { %575 = vmatmul.mubr.msk.f32.gmra.mrb[2].mxu1 %vm203_vm0, %v183_v19  ;;  %565 = vmatprep.mubr.msk.f32.mxu0 %vm203_vm0, %v176_v20 }
  0x26   : > { %577 = vmatprep.mubr.msk.f32.mxu1 %vm203_vm0, %v184_v21 }
  0x28   : > { %566 = vmatmul.mubr.msk.f32.gmra.mrb[4].mxu0 %vm203_vm0, %v177_v22 }
  0x29   : > { %578 = vmatmul.mubr.msk.f32.gmra.mrb[4].mxu1 %vm203_vm0, %v185_v23  ;;  %568 = vmatprep.mubr.msk.f32.mxu0 %vm203_vm0, %v178_v24 }
  0x2a   : > { %580 = vmatprep.mubr.msk.f32.mxu1 %vm203_vm0, %v186_v25 }
  0x2c   : > { %569 = vmatmul.mubr.msk.f32.gmra.mrb[6].mxu0 %vm203_vm0, %v179_v26 }
  0x2d   : > { %581 = vmatmul.mubr.msk.f32.gmra.mrb[6].mxu1 %vm203_vm0, %v187_v27 }
  0xf3   : > { %v561_v29 = vpop.f32.mrb[0].mxu0 }
  0xf4   : > { %v573_v30 = vpop.f32.mrb[0].mxu1  ;;  %v324_v31 = vadd.f32 %v561_v29, %v496_v28  ;;  %v318_v33 = vpop.f32.mrb[1].mxu0 }
  0xf5   : > { %v364_v32 = vadd.f32 %v573_v30, %v496_v28  ;;  %v358_v34 = vpop.f32.mrb[1].mxu1  ;;  %v319_v35 = vadd.f32 %v496_v28, %v318_v33 }
  0xf6   : > { %v359_v36 = vadd.f32 %v496_v28, %v358_v34  ;;  %398 = vst [vmem:[%s851_s4 + $0x8] sm:$0xff] %v324_v31 }
  0xf7   : > { %406 = vst [vmem:[%s851_s4 + $0x48] sm:$0xff] %v364_v32  ;;  %397 = vst [vmem:[%s851_s4] sm:$0xff] %v319_v35  ;;  %v564_v37 = vpop.f32.mrb[2].mxu0 }
  0xf8   : > { %405 = vst [vmem:[%s851_s4 + $0x40] sm:$0xff] %v359_v36  ;;  %v576_v38 = vpop.f32.mrb[2].mxu1  ;;  %v334_v39 = vadd.f32 %v564_v37, %v496_v28  ;;  %v328_v41 = vpop.f32.mrb[3].mxu0 }
  0xf9   : > { %v374_v40 = vadd.f32 %v576_v38, %v496_v28  ;;  %v368_v42 = vpop.f32.mrb[3].mxu1  ;;  %v329_v43 = vadd.f32 %v496_v28, %v328_v41 }
  0xfa   : > { %v369_v44 = vadd.f32 %v496_v28, %v368_v42  ;;  %400 = vst [vmem:[%s851_s4 + $0x18] sm:$0xff] %v334_v39 }
  0xfb   : > { %408 = vst [vmem:[%s851_s4 + $0x58] sm:$0xff] %v374_v40  ;;  %399 = vst [vmem:[%s851_s4 + $0x10] sm:$0xff] %v329_v43  ;;  %v567_v45 = vpop.f32.mrb[4].mxu0 }
  0xfc   : > { %407 = vst [vmem:[%s851_s4 + $0x50] sm:$0xff] %v369_v44  ;;  %v579_v46 = vpop.f32.mrb[4].mxu1  ;;  %v344_v47 = vadd.f32 %v567_v45, %v496_v28  ;;  %v338_v49 = vpop.f32.mrb[5].mxu0 }
  0xfd   : > { %v384_v48 = vadd.f32 %v579_v46, %v496_v28  ;;  %v378_v50 = vpop.f32.mrb[5].mxu1  ;;  %v339_v51 = vadd.f32 %v496_v28, %v338_v49 }
  0xfe   : > { %v379_v52 = vadd.f32 %v496_v28, %v378_v50  ;;  %402 = vst [vmem:[%s851_s4 + $0x28] sm:$0xff] %v344_v47 }
  0xff   : > { %410 = vst [vmem:[%s851_s4 + $0x68] sm:$0xff] %v384_v48  ;;  %401 = vst [vmem:[%s851_s4 + $0x20] sm:$0xff] %v339_v51  ;;  %v570_v53 = vpop.f32.mrb[6].mxu0 }
 0x100   : > { %409 = vst [vmem:[%s851_s4 + $0x60] sm:$0xff] %v379_v52  ;;  %v582_v54 = vpop.f32.mrb[6].mxu1  ;;  %v354_v55 = vadd.f32 %v570_v53, %v496_v28  ;;  %v348_v57 = vpop.f32.mrb[7].mxu0 }
 0x101   : > { %v394_v56 = vadd.f32 %v582_v54, %v496_v28  ;;  %v388_v58 = vpop.f32.mrb[7].mxu1  ;;  %v349_v59 = vadd.f32 %v496_v28, %v348_v57 }
 0x102   : > { %v389_v60 = vadd.f32 %v496_v28, %v388_v58  ;;  %404 = vst [vmem:[%s851_s4 + $0x38] sm:$0xff] %v354_v55 }
 0x103   : > { %412 = vst [vmem:[%s851_s4 + $0x78] sm:$0xff] %v394_v56  ;;  %403 = vst [vmem:[%s851_s4 + $0x30] sm:$0xff] %v349_v59 }
 0x104   : > { %411 = vst [vmem:[%s851_s4 + $0x70] sm:$0xff] %v389_v60 }
 0x105   : > { %661 = shalt.err (!%p658_p3)
}
 0x106   : > { %s662_s20 = scalar_lea.hbm %s870_s16, 2048  ;;  %s666_s26 = scalar_lea.hbm %s924_s3, 4096 }
 0x107   : > { %p663_p4 = scmp.ne.s32.totalorder %s870_s16, %s662_s20  ;;  %p667_p9 = scmp.lt.u32.totalorder %s870_s16, %s924_s3 }
 0x108   : > { %p668_p10 = scmp.lt.u32.totalorder %s666_s26, %s662_s20  ;;  %p670_p12 = scmp.lt.u32.totalorder %s662_s20, %s870_s16 }
 0x109   : > { %p664_p7 = pnand %p663_p4, %p773_p5 }
 0x10a   : > { %p669_p11 = por %p668_p10, %p667_p9 }
 0x10b   : > { %p665_p8 = pneg %p664_p7 }
 0x10c   : > { %p671_p13 = por %p670_p12, %p669_p11 }
 0x10e   : > { %p672_p0 = pnand %p671_p13, %p665_p8 }
 0x110   : > { %675 = shalt.err (!%p672_p0)
}
 0x111   : > { %s713_s29 = smov 128   ;;  %s714_s30 = smov 8  }
 0x112   : > { %607 = dma.vmem_to_hbm [thread:$0]  (%p773_p5), %s872_s6, 2048, %s870_s16, %s880_s9, %s713_s29, %s713_s29, %s714_s30  }
 0x113 PF: > { %p613_p1 = scmp.ge.s32.totalorder %s710_s15, 2  ;;  %s442_s4 = sand.u32 1, %s698_s12  }
 0x114   : > { %s443_s5 = scalar_lea.sflag [#allocation3], %s442_s4 }
 0x115   : > { %p610_p2 = pnand %p613_p1, %p777_p6 }
 0x117   : > { %693 = dma.done.wait (!%p610_p2), %s443_s5, 2048  }
 0x118   : > { %695 = vsyncadd (!%p610_p2), %s443_s5, 4294965248  ;;  %p13_p3 = scmp.ge.s32.totalorder %s760_s18, 4   ;;  %s927_s12 = smov %s702_s13 }
 0x119   : > { %s928_s13 = smov %s706_s14  ;;  %s929_s14 = smov %s771_s21 }
 0x11a   : > { %s930_s15 = smov %s760_s18  ;;  %15 = sbr.rel (!%p13_p3) target bundleno = 3 (0x3), region = 67 }
 0x121   :  { %448 = vsyncpa [#allocation3], 1 }
 0x122   :  { %450 = vsyncpa [#allocation3 + $0x1], 1 }

</bundles_post_ra>
